<compile_context>
chip_gen: v7x
topology: tpu7x:2x2x1
jax: 0.10.0
libtpu: 0.0.40
codegen_flags: <defaults>
</compile_context>

<pallas_src>
import functools

import jax
import jax.numpy as jnp
from jax.experimental import pallas as pl
from jax.experimental.pallas import tpu as pltpu


def _layernorm_kernel(x_ref, gamma_ref, beta_ref, o_ref, *, epsilon, inv_hidden):
    # x_ref: (row_tile, hidden); gamma_ref/beta_ref: (1, hidden), already f32.
    # NOTE: tail (partial) grid blocks contain unmasked garbage rows read from
    # HBM; everything below is strictly per-row, and the output write of those
    # rows is masked, so the garbage never leaks.  Do NOT add cross-row ops.
    x = x_ref[...].astype(jnp.float32)

    # Two-pass statistics: mu first, then the centered second moment on the
    # same VMEM-resident tile.  ~2 extra VPU ops/elem, fully hidden under the
    # HBM roofline, and no E[x^2]-E[x]^2 cancellation for |mean| >> std.
    mu = jnp.sum(x, axis=-1, keepdims=True) * inv_hidden
    xc = x - mu
    var = jnp.sum(xc * xc, axis=-1, keepdims=True) * inv_hidden
    sigma = jnp.sqrt(var)

    # Module semantics: epsilon is added to std (sigma), NOT to var (matches
    # the custom PyTorch module / torch.std(unbiased=False), not nn.LayerNorm).
    denom = sigma + epsilon
    # EUP approximate reciprocal (otherwise-idle slot) + one Newton-Raphson
    # step on the tiny (row_tile, 1) tensor -> ~full f32 accuracy, no divide.
    inv = pl.reciprocal(denom, approx=True)
    inv = inv * (2.0 - denom * inv)

    out = gamma_ref[...] * (xc * inv) + beta_ref[...]
    o_ref[...] = out.astype(o_ref.dtype)


def _chip_info():
    """Return (per-core VMEM capacity in bytes, lowercase device_kind)."""
    kind = ""
    try:
        kind = jax.devices()[0].device_kind.lower()
    except Exception:
        pass
    vmem = None
    try:
        # Reports per-TensorCore VMEM (64 MiB on v7x, 128 MiB on v5e/v6e).
        vmem = int(pltpu.get_tpu_info().vmem_capacity_bytes)
    except Exception:
        pass
    if vmem is None:
        # AOT / CPU tracing fallback: key off the device kind instead of
        # unconditionally assuming the smallest (v7x) VMEM.
        if "v7" in kind:
            vmem = 64 << 20
        elif any(g in kind for g in ("v4", "v5", "v6")):
            vmem = 128 << 20
        else:
            vmem = 64 << 20  # unknown part: stay conservative
    return vmem, kind


def _pick_tiling(rows, hidden, dtype):
    """Pick (row_tile, vmem_limit_bytes, x_buffer_count)."""
    itemsize = jnp.dtype(dtype).itemsize
    # Sublane packing alignment: 8 rows for 32-bit, 16 for bf16, 32 for 8-bit.
    if itemsize >= 4:
        align = 8
    elif itemsize == 2:
        align = 16
    else:
        align = 32

    vmem_phys, kind = _chip_info()
    small_vmem = vmem_phys <= (64 << 20)  # v7x per-TC VMEM
    # Generation-aware budget: conservative half on 64 MiB parts, spend ~65%
    # of the 128 MiB parts (v5e/v6e) so wide-hidden tiles roughly double.
    budget = (vmem_phys // 2) if small_vmem else int(vmem_phys * 0.65)

    # Per grid step the pipeline holds double-buffered input + double-buffered
    # output (4 * hidden * itemsize bytes/row) plus ~2 f32 working copies.
    per_row_bytes = 4 * hidden * itemsize + 2 * hidden * 4
    max_rows_fit = budget // max(per_row_bytes, 1)

    # Byte-based block target: ~4 MiB of input per grid step.  Blocks below
    # ~1 MiB measurably lose HBM bandwidth, and a fixed row cap starves
    # narrow-hidden shapes; sizing by bytes keeps every width near roofline.
    target_block_bytes = 4 << 20
    target_rows = target_block_bytes // max(hidden * itemsize, 1)

    row_tile = min(max_rows_fit, target_rows)
    row_tile = (row_tile // align) * align
    row_tile = max(row_tile, align)

    # Keep >= ~4 grid steps for large problems so both v7x TensorCores get
    # work and the DMA pipeline has something to overlap with.
    if rows >= 4 * align:
        quarter = -(-rows // 4)                    # ceil(rows / 4)
        quarter = -(-quarter // align) * align     # round up to alignment
        row_tile = max(align, min(row_tile, quarter))

    # Never exceed the (alignment-rounded) total row count.
    row_tile = min(row_tile, -(-rows // align) * align)

    # Prefer an even grid-step count (balanced megacore split on v7x; avoids
    # one core idling on the masked tail block).
    steps = -(-rows // row_tile)
    if steps > 1 and steps % 2 == 1:
        alt = -(-rows // (steps + 1))
        alt = -(-alt // align) * align
        if alt >= align and (-(-rows // alt)) % 2 == 0:
            row_tile = alt

    # VMEM limit: cover what the pipeline actually needs (+headroom for the
    # compiler).  The `need` term also closes the extreme-hidden edge case
    # where max_rows_fit < align: a single align-row block must still fit.
    need = row_tile * per_row_bytes + (8 << 20)
    ceiling = vmem_phys - (8 << 20)
    vmem_limit = max(32 << 20, min(ceiling, max(need, budget + (8 << 20))))
    # TODO(synk): for hidden so wide that even one align-row block exceeds the
    # per-core VMEM ceiling (v7x only), a hidden-split second grid axis with
    # sum / sum-of-squares accumulators would be needed.

    # v5e only (lowest HBM BW, plentiful 128 MiB VMEM): a 3rd input buffer
    # hides DMA issue latency when blocks end up small.  Never on v7x.
    use_buffered3 = (
        ("v5" in kind)
        and (not small_vmem)
        and (row_tile * hidden * itemsize < (1 << 20))
    )
    x_buffers = 3 if use_buffered3 else 2
    return int(row_tile), int(vmem_limit), x_buffers


def _x_block_spec(row_tile, hidden, buffer_count):
    index_map = lambda i: (i, 0)
    if buffer_count > 2 and hasattr(pl, "Buffered"):
        try:
            return pl.BlockSpec((row_tile, hidden), index_map,
                                pipeline_mode=pl.Buffered(buffer_count))
        except TypeError:
            pass
    return pl.BlockSpec((row_tile, hidden), index_map)


def layer_normalization(x, gamma, beta, epsilon=1e-5, row_tile=None):
    """LayerNormalization forward, matching the PyTorch module exactly.

    x: (..., hidden); gamma, beta: (hidden,)
    """
    hidden = x.shape[-1]
    lead_shape = x.shape[:-1]
    rows = 1
    for d in lead_shape:
        rows *= d
    x2 = x.reshape(rows, hidden)

    # Hoist the tiny parameter casts out of the per-tile kernel body.
    gamma2 = gamma.astype(jnp.float32).reshape(1, hidden)
    beta2 = beta.astype(jnp.float32).reshape(1, hidden)

    auto_tile, vmem_limit, x_buffers = _pick_tiling(rows, hidden, x.dtype)
    if row_tile is None:
        row_tile = auto_tile

    # No padded copy of x in HBM: cdiv grid; the tail block's out-of-bounds
    # rows are masked on writeback (all in-kernel math is per-row).
    # If hidden % 128 != 0 stores are masked vst.msk; padding hidden would cost
    # a full extra HBM round trip on this memory-bound kernel, so we accept it
    # (hidden equals the full last dim, so the BlockSpec stays legal).
    grid = (pl.cdiv(rows, row_tile),)

    out = pl.pallas_call(
        functools.partial(_layernorm_kernel, epsilon=epsilon, inv_hidden=1.0 / hidden),
        out_shape=jax.ShapeDtypeStruct((rows, hidden), x.dtype),
        grid_spec=pltpu.PrefetchScalarGridSpec(
            num_scalar_prefetch=0,
            grid=grid,
            in_specs=[
                _x_block_spec(row_tile, hidden, x_buffers),
                pl.BlockSpec((1, hidden), lambda i: (0, 0)),
                pl.BlockSpec((1, hidden), lambda i: (0, 0)),
            ],
            out_specs=pl.BlockSpec((row_tile, hidden), lambda i: (i, 0)),
        ),
        compiler_params=pltpu.CompilerParams(
            dimension_semantics=("parallel",),
            vmem_limit_bytes=vmem_limit,
        ),
    )(x2, gamma2, beta2)

    return out.reshape(*lead_shape, hidden)


def layer_normalization_ref(x, gamma, beta, epsilon=1e-5):
    mu = jnp.mean(x, axis=-1, keepdims=True)
    sigma = jnp.sqrt(jnp.mean((x - mu) ** 2, axis=-1, keepdims=True))
    return gamma * ((x - mu) / (sigma + epsilon)) + beta


if __name__ == "__main__":
    batch, seq, hidden = 2, 8, 32
    key = jax.random.PRNGKey(0)
    x = jax.random.normal(key, (batch, seq, hidden), dtype=jnp.float32)

    # Deterministic parameter init matching nn.Parameter(torch.ones/zeros).
    gamma = jnp.ones((hidden,), dtype=jnp.float32)
    beta = jnp.zeros((hidden,), dtype=jnp.float32)

    out = layer_normalization(x, gamma, beta, epsilon=1e-5)
    out = jax.block_until_ready(out)
    ref = layer_normalization_ref(x, gamma, beta, epsilon=1e-5)
    assert out.shape == x.shape
    assert jnp.allclose(out, ref, atol=2e-5, rtol=2e-5)

    # Also exercise the no-padding tail path (rows not a multiple of the tile).
    x_tail = jax.random.normal(jax.random.PRNGKey(1), (3, 5, hidden), dtype=jnp.float32)
    out_tail = jax.block_until_ready(layer_normalization(x_tail, gamma, beta))
    ref_tail = layer_normalization_ref(x_tail, gamma, beta)
    assert out_tail.shape == x_tail.shape
    assert jnp.allclose(out_tail, ref_tail, atol=2e-5, rtol=2e-5)

    print("KERNEL_OK")
</pallas_src>

<mosaic_0001>
module attributes {stable_mosaic.version = 11 : i64} {
  func.func @_layernorm_kernel(%arg0: i32, %arg1: memref<16x32xf32, #tpu.memory_space<vmem>>, %arg2: memref<1x32xf32, #tpu.memory_space<vmem>>, %arg3: memref<1x32xf32, #tpu.memory_space<vmem>>, %arg4: memref<16x32xf32, #tpu.memory_space<vmem>>) attributes {dimension_semantics = [#tpu.dimension_semantics<parallel>], iteration_bounds = array<i64: 1>, scalar_prefetch = 0 : i64, scratch_operands = 0 : i64, tpu.core_type = #tpu.core_type<tc>, window_params = [{transform_indices = @transform_0, window_bounds = array<i64: 16, 32>}, {pipeline_mode = #tpu.pipeline_mode<synchronous>, transform_indices = @transform_1, window_bounds = array<i64: 1, 32>}, {pipeline_mode = #tpu.pipeline_mode<synchronous>, transform_indices = @transform_2, window_bounds = array<i64: 1, 32>}, {transform_indices = @transform_3, window_bounds = array<i64: 16, 32>}]} {
    %c0 = arith.constant 0 : index
    %c0_0 = arith.constant 0 : index
    %0 = vector.load %arg1[%c0, %c0_0] : memref<16x32xf32, #tpu.memory_space<vmem>>, vector<16x32xf32>
    %cst = arith.constant dense<0.000000e+00> : vector<16xf32>
    %1 = vector.multi_reduction <add>, %0, %cst [1] : vector<16x32xf32> to vector<16xf32>
    %2 = vector.shape_cast %1 : vector<16xf32> to vector<16x1xf32>
    %cst_1 = arith.constant 3.125000e-02 : f32
    %3 = vector.broadcast %cst_1 : f32 to vector<16x1xf32>
    %4 = arith.mulf %2, %3 : vector<16x1xf32>
    %5 = vector.broadcast %4 : vector<16x1xf32> to vector<16x32xf32>
    %6 = arith.subf %0, %5 : vector<16x32xf32>
    %7 = arith.mulf %6, %6 : vector<16x32xf32>
    %cst_2 = arith.constant dense<0.000000e+00> : vector<16xf32>
    %8 = vector.multi_reduction <add>, %7, %cst_2 [1] : vector<16x32xf32> to vector<16xf32>
    %9 = vector.shape_cast %8 : vector<16xf32> to vector<16x1xf32>
    %cst_3 = arith.constant 3.125000e-02 : f32
    %10 = vector.broadcast %cst_3 : f32 to vector<16x1xf32>
    %11 = arith.mulf %9, %10 : vector<16x1xf32>
    %12 = math.sqrt %11 : vector<16x1xf32>
    %cst_4 = arith.constant 9.99999974E-6 : f32
    %13 = vector.broadcast %cst_4 : f32 to vector<16x1xf32>
    %14 = arith.addf %12, %13 : vector<16x1xf32>
    %15 = tpu.reciprocal %14 {approx = true} : vector<16x1xf32> -> vector<16x1xf32>
    %16 = arith.mulf %14, %15 : vector<16x1xf32>
    %cst_5 = arith.constant 2.000000e+00 : f32
    %17 = vector.broadcast %cst_5 : f32 to vector<16x1xf32>
    %18 = arith.subf %17, %16 : vector<16x1xf32>
    %19 = arith.mulf %15, %18 : vector<16x1xf32>
    %c0_6 = arith.constant 0 : index
    %c0_7 = arith.constant 0 : index
    %20 = vector.load %arg2[%c0_6, %c0_7] : memref<1x32xf32, #tpu.memory_space<vmem>>, vector<1x32xf32>
    %21 = vector.broadcast %19 : vector<16x1xf32> to vector<16x32xf32>
    %22 = arith.mulf %6, %21 : vector<16x32xf32>
    %23 = vector.broadcast %20 : vector<1x32xf32> to vector<16x32xf32>
    %24 = arith.mulf %23, %22 : vector<16x32xf32>
    %c0_8 = arith.constant 0 : index
    %c0_9 = arith.constant 0 : index
    %25 = vector.load %arg3[%c0_8, %c0_9] : memref<1x32xf32, #tpu.memory_space<vmem>>, vector<1x32xf32>
    %26 = vector.broadcast %25 : vector<1x32xf32> to vector<16x32xf32>
    %27 = arith.addf %24, %26 : vector<16x32xf32>
    %c0_10 = arith.constant 0 : index
    %c0_11 = arith.constant 0 : index
    %28 = vector.load %arg4[%c0_10, %c0_11] : memref<16x32xf32, #tpu.memory_space<vmem>>, vector<16x32xf32>
    tpu.vector_store %arg4[%c0_10, %c0_11], %27 {strides = array<i32>} : memref<16x32xf32, #tpu.memory_space<vmem>>, vector<16x32xf32>,
    return
  }
  func.func @transform_0(%arg0: i32) -> (i32, i32) {
    %c0_i32 = arith.constant 0 : i32
    %c0_i32_0 = arith.constant 0 : i32
    return %arg0, %c0_i32 : i32, i32
  }
  func.func @transform_1(%arg0: i32) -> (i32, i32) {
    %c0_i32 = arith.constant 0 : i32
    %c0_i32_0 = arith.constant 0 : i32
    %c0_i32_1 = arith.constant 0 : i32
    return %c0_i32, %c0_i32_0 : i32, i32
  }
  func.func @transform_2(%arg0: i32) -> (i32, i32) {
    %c0_i32 = arith.constant 0 : i32
    %c0_i32_0 = arith.constant 0 : i32
    %c0_i32_1 = arith.constant 0 : i32
    return %c0_i32, %c0_i32_0 : i32, i32
  }
  func.func @transform_3(%arg0: i32) -> (i32, i32) {
    %c0_i32 = arith.constant 0 : i32
    %c0_i32_0 = arith.constant 0 : i32
    return %arg0, %c0_i32 : i32, i32
  }
}

</mosaic_0001>

<bundles_post_ra>
// kernel: tpu_custom_call.1
= control target key start
LH: loop header
LB: loop body
LE: loop exit
PB: predicated region body
PF: predicated region fallthrough
CT: control target
= control target key end

     0   :  { %8 = vsyncpa [#allocation3], 0  ;;  %s243_s0 = inlined_call_operand.hbm [shape: f32[16,32], index: 0, kind: input, shape index: {}]   ;;  %s244_s1 = inlined_call_operand.vmem [shape: f32[1,32], index: 1, kind: input, shape index: {}]   ;;  %s245_s2 = inlined_call_operand.vmem [shape: f32[1,32], index: 2, kind: input, shape index: {}]   ;;  %s246_s3 = inlined_call_operand.hbm [shape: f32[16,32], index: 3, kind: output, shape index: {}]  }
   0x1   :  { %9 = vsyncpa [#allocation4], 0  ;;  %s177_s12 = smov [#allocation2]   ;;  %s129_s16 = scalar_lea.hbm %s243_s0, 256 }
   0x2   :  { %s15_s13 = sshll.u32 %s177_s12, 4  ;;  %p130_p0 = scmp.ne.s32.totalorder %s243_s0, %s129_s16  ;;  %s16_s13 = int_to_ptr.vmem [resolvable:$true] %s15_s13 }
   0x3   :  { %p133_p1 = scmp.lt.u32.totalorder %s129_s16, %s243_s0 }
   0x5   :  { %p135_p2 = pnand %p133_p1, %p130_p0 }
   0x7   :  { %138 = shalt.err (!%p135_p2)
}
   0x8   :  { %s139_s21 = scalar_lea.vmem %s16_s13, 256  ;;  %p144_p4 = scmp.lt.s32.totalorder %s16_s13, %s16_s13 }
   0x9   :  { %p140_p3 = scmp.ne.s32.totalorder %s16_s13, %s139_s21  ;;  %p145_p5 = scmp.lt.s32.totalorder %s139_s21, %s139_s21 }
   0xb   :  { %p146_p6 = por %p145_p5, %p144_p4 }
   0xd   :  { %p147_p7 = pnand %p146_p6, %p140_p3 }
   0xf   :  { %150 = shalt.err (!%p147_p7)
}
  0x10   :  { %s178_s22 = smov 128   ;;  %s179_s23 = smov 8  }
  0x11   :  { %21 = dma.hbm_to_vmem [thread:$0]  %s243_s0, 256, %s16_s13, [#allocation3], %s178_s22, %s178_s22, %s179_s23  }
  0x12   :  { %173 = dma.done.wait [#allocation3], 256  }
  0x13   :  { %174 = vsyncadd [#allocation3], 4294967040  ;;  %vm31_vm0 = vcmask 261120   ;;  %v29_v0 = vld [vmem:[#allocation2] sm:$0xff]  ;;  %v30_v1 = vld [vmem:[#allocation2 + $0x8] sm:$0xff]  ;;  %s180_s29 = smov [#allocation5]  }
  0x14   :  { %v32_v2 = vsel %vm31_vm0, %v29_v0, 0.0  ;;  %v35_v3 = vsel %vm31_vm0, %v30_v1, 0.0  ;;  %v115_v36 = vld [vmem:[%s244_s1] ss:$0 sm:$0xff]  ;;  %s103_s30 = sshll.u32 %s180_s29, 4  ;;  %s104_s30 = int_to_ptr.vmem [resolvable:$true] %s103_s30 }
  0x15   :  { %33 = vadd.xlane.f32.xlu0 %v32_v2  ;;  %v116_v39 = vld [vmem:[%s245_s2] ss:$0 sm:$0xff]  ;;  %s151_s1 = scalar_lea.vmem %s104_s30, 256  ;;  %p156_p9 = scmp.lt.s32.totalorder %s104_s30, %s104_s30 }
  0x16   :  { %p152_p8 = scmp.ne.s32.totalorder %s104_s30, %s151_s1  ;;  %p157_p10 = scmp.lt.s32.totalorder %s151_s1, %s151_s1 }
  0x18   :  { %p158_p11 = por %p157_p10, %p156_p9 }
  0x19   :  { %36 = vadd.xlane.f32.xlu0 %v35_v3 }
  0x1a   :  { %p159_p12 = pnand %p158_p11, %p152_p8 }
  0xa2   :  { %v34_v4 = vpop.xlane.xlu0 %33 }
  0xa3   :  { %v38_v5 = vmul.f32 0.03125, %v34_v4 }
  0xa5   :  { %v40_v6 = vsub.f32 %v29_v0, %v38_v5 }
  0xa6   :  { %v37_v7 = vpop.xlane.xlu0 %36 }
  0xa7   :  { %v39_v8 = vmul.f32 0.03125, %v37_v7  ;;  %v42_v9 = vmul.f32 %v40_v6, %v40_v6 }
  0xa9   :  { %v41_v10 = vsub.f32 %v30_v1, %v39_v8  ;;  %v44_v11 = vsel %vm31_vm0, %v42_v9, 0.0 }
  0xaa   :  { %45 = vadd.xlane.f32.xlu1 %v44_v11 }
  0xab   :  { %v43_v12 = vmul.f32 %v41_v10, %v41_v10 }
  0xad   :  { %v47_v13 = vsel %vm31_vm0, %v43_v12, 0.0 }
  0xae   :  { %48 = vadd.xlane.f32.xlu1 %v47_v13 }
 0x137   :  { %v46_v14 = vpop.xlane.xlu1 %45 }
 0x138   :  { %v50_v15 = vmul.f32 0.03125, %v46_v14 }
 0x13a   :  { %121 = vrsqrt.f32 %v50_v15  ;;  %vm54_vm1 = vcmp.eq.f32.partialorder %v50_v15, inf  ;;  %v57_v20 = vand.u32 2147483648, %v50_v15  ;;  %vm56_vm2 = vcmp.eq.f32.partialorder %v50_v15, 0.0 }
 0x13b   :  { %v49_v16 = vpop.xlane.xlu1 %48 }
 0x13c   :  { %v51_v17 = vmul.f32 0.03125, %v49_v16 }
 0x13e   :  { %123 = vrsqrt.f32 %v51_v17  ;;  %vm61_vm3 = vcmp.eq.f32.partialorder %v51_v17, inf  ;;  %v64_v26 = vand.u32 2147483648, %v51_v17  ;;  %vm63_vm4 = vcmp.eq.f32.partialorder %v51_v17, 0.0 }
 0x144   :  { %v122_v18 = vpop.eup %121 }
 0x145   :  { %v53_v19 = vmul.f32 %v122_v18, %v50_v15 }
 0x147   :  { %v55_v21 = vsel %vm54_vm1, %v50_v15, %v53_v19 }
 0x148   :  { %v124_v22 = vpop.eup %123  ;;  %v58_v23 = vsel %vm56_vm2, %v57_v20, %v55_v21 }
 0x149   :  { %v60_v24 = vmul.f32 %v124_v22, %v51_v17  ;;  %v66_v25 = vadd.f32 1e-05, %v58_v23 }
 0x14b   :  { %v62_v27 = vsel %vm61_vm3, %v51_v17, %v60_v24  ;;  %125 = vrcp.f32 %v66_v25 }
 0x14c   :  { %v65_v28 = vsel %vm63_vm4, %v64_v26, %v62_v27 }
 0x14d   :  { %v67_v29 = vadd.f32 1e-05, %v65_v28 }
 0x14f   :  { %127 = vrcp.f32 %v67_v29 }
 0x155   :  { %v126_v30 = vpop.eup %125 }
 0x156   :  { %v70_v31 = vmul.f32 %v126_v30, %v66_v25 }
 0x158   :  { %v72_v32 = vsub.f32 2.0, %v70_v31 }
 0x159   :  { %v128_v33 = vpop.eup %127 }
 0x15a   :  { %v71_v34 = vmul.f32 %v128_v33, %v67_v29  ;;  %v74_v35 = vmul.f32 %v126_v30, %v72_v32 }
 0x15c   :  { %v73_v37 = vsub.f32 2.0, %v71_v34  ;;  %v77_v38 = vmul.f32 %v74_v35, %v40_v6 }
 0x15e   :  { %v75_v40 = vmul.f32 %v128_v33, %v73_v37  ;;  %v85_v41 = vmul.f32 %v115_v36, %v77_v38 }
 0x160   :  { %v78_v42 = vmul.f32 %v75_v40, %v41_v10  ;;  %v94_v43 = vadd.f32 %v116_v39, %v85_v41 }
 0x162   :  { %v86_v44 = vmul.f32 %v115_v36, %v78_v42  ;;  %96 = vst.msk [vmem:[#allocation5] sm:$0xff] %vm31_vm0, %v94_v43 }
 0x164   :  { %v95_v45 = vadd.f32 %v116_v39, %v86_v44 }
 0x166   :  { %97 = vst.msk [vmem:[#allocation5 + $0x8] sm:$0xff] %vm31_vm0, %v95_v45 }
 0x167   :  { %162 = shalt.err (!%p159_p12)
}
 0x168   :  { %s163_s5 = scalar_lea.hbm %s246_s3, 256 }
 0x169   :  { %p164_p13 = scmp.ne.s32.totalorder %s246_s3, %s163_s5  ;;  %p167_p0 = scmp.lt.u32.totalorder %s163_s5, %s246_s3 }
 0x16b   :  { %p169_p1 = pnand %p167_p0, %p164_p13 }
 0x16d   :  { %172 = shalt.err (!%p169_p1)
}
 0x16e   :  { %109 = dma.vmem_to_hbm [thread:$0]  %s104_s30, 256, %s246_s3, [#allocation4], %s178_s22, %s178_s22, %s179_s23  }
 0x16f   :  { %175 = dma.done.wait [#allocation4], 256  }
 0x170   :  { %176 = vsyncadd [#allocation4], 4294967040 }
 0x171   :  { %113 = vsyncpa [#allocation3], 1 }
 0x172   :  { %114 = vsyncpa [#allocation4], 1 }

</bundles_post_ra>
